<compile_context>
chip_gen: v6e
topology: v6e:2x2x1
jax: 0.10.0
libtpu: 0.0.40
codegen_flags: <defaults>
</compile_context>

<pallas_src>
import functools

import numpy as np
import jax
import jax.numpy as jnp
from jax.experimental import pallas as pl
from jax.experimental.pallas import tpu as pltpu


def _round_up(x, m):
    return (x + m - 1) // m * m


def mlp_skip_kernel(x_ref, w1_ref, ws_ref, b_ref, o_ref, *,
                    h1, h2, h3, c1, r1, r2, nca):
    # Layer 1: out1 = relu(x @ W1 + b1).  bf16 MXU operands, f32 accumulate,
    # f32 bias/ReLU epilogue.
    x = x_ref[...].astype(jnp.bfloat16)
    out1 = jnp.dot(x, w1_ref[...], preferred_element_type=jnp.float32)
    out1 = jnp.maximum(out1 + b_ref[0:1, 0:h1], 0.0)

    # Fused layer-2 / layer-3a matmul: out1 @ [ W2 | pad | W3a | pad ].
    t = jnp.dot(out1.astype(jnp.bfloat16), ws_ref[0:h1, :],
                preferred_element_type=jnp.float32)
    out2 = jnp.maximum(t[:, 0:h2] + b_ref[1:2, 0:h2], 0.0)
    p3 = t[:, c1:c1 + h3]                          # out1 @ W3a (lane offset c1)

    # Fused layer-4a / layer-3b matmul: out2 @ [ W4a | pad | W3b | pad ].
    # Both adds below combine slices at identical lane offsets -> no XLU shuffle.
    u = jnp.dot(out2.astype(jnp.bfloat16), ws_ref[r1:r1 + h2, :],
                preferred_element_type=jnp.float32)
    out3 = jnp.maximum(p3 + u[:, c1:c1 + h3] + b_ref[2:3, c1:c1 + h3], 0.0)
    p4 = u[:, 0:nca]                               # out2 @ W4a (lane-padded)

    # Final layer (no activation): out = out3 @ W4b + out2 @ W4a + b4.
    out = jnp.dot(out3.astype(jnp.bfloat16), ws_ref[r2:r2 + h3, 0:nca],
                  preferred_element_type=jnp.float32)
    o_ref[...] = (out + p4 + b_ref[3:4, 0:nca]).astype(o_ref.dtype)


def pack_params(raw, num_classes):
    """Pack PyTorch-layout params into 3 kernel operands (done once, off the
    hot path): W1 (bf16), a lane/sublane-aligned bf16 slab holding
    [W2|W3a ; W4a|W3b ; W4b], and an f32 bias pack."""
    w1, b1, w2, b2, w3, b3, w4, b4 = [np.asarray(a) for a in raw]
    F, h1 = w1.shape
    h2 = w2.shape[1]
    h3 = w3.shape[1]
    nc = num_classes
    nca = _round_up(nc, 128)
    c1 = _round_up(max(h2, nc), 128)   # lane offset of the W3a / W3b column block
    r1 = _round_up(h1, 8)              # sublane offset of row block 1 (W4a|W3b)
    r2 = r1 + _round_up(h2, 8)         # sublane offset of row block 2 (W4b)
    r3 = r2 + _round_up(h3, 8)         # total slab rows

    # Column-block split of the concat weights (torch.cat elimination).
    w3a, w3b = w3[:h1], w3[h1:]        # (h1,h3), (h2,h3)
    w4a, w4b = w4[:h2], w4[h2:]        # (h2,nc), (h3,nc)

    slab_w = c1 + _round_up(h3, 128)
    slab = np.zeros((r3, slab_w), np.float32)
    # row block 0: [ W2 | 0 | W3a | 0 ]
    slab[0:h1, 0:h2] = w2
    slab[0:h1, c1:c1 + h3] = w3a
    # row block 1: [ W4a | 0 | W3b | 0 ]  (W4a product aligns with W4b product,
    #                                      W3b product aligns with p3)
    slab[r1:r1 + h2, 0:nc] = w4a
    slab[r1:r1 + h2, c1:c1 + h3] = w3b
    # row block 2: [ W4b | 0 ]
    slab[r2:r2 + h3, 0:nc] = w4b

    bias_w = _round_up(max(h1, h2, c1 + h3, nca), 128)
    biases = np.zeros((4, bias_w), np.float32)
    biases[0, 0:h1] = b1.reshape(-1)
    biases[1, 0:h2] = b2.reshape(-1)
    biases[2, c1:c1 + h3] = b3.reshape(-1)   # stored lane-aligned with p3
    biases[3, 0:nc] = b4.reshape(-1)

    return dict(
        w1=jnp.asarray(w1, jnp.bfloat16),
        slab=jnp.asarray(slab, jnp.bfloat16),
        biases=jnp.asarray(biases, jnp.float32),
        dims=dict(F=F, h1=h1, h2=h2, h3=h3, nc=nc, nca=nca,
                  c1=c1, r1=r1, r2=r2),
    )


def mlp_skip_forward(x_nchw, packed):
    d = packed["dims"]
    F, nc, nca = d["F"], d["nc"], d["nca"]

    B = x_nchw.shape[0]
    x2d = x_nchw.reshape(B, -1)                  # nn.Flatten (free view)
    assert x2d.shape[1] == F
    # Do NOT pre-cast x to bf16 here: a wrapper-side cast is a separate HBM
    # read+write pass.  The kernel casts per-tile after the DMA (and accepts
    # a bf16 input unchanged if the producer already emits bf16).

    # Tiny sublane pad only for small batches; large batches run unpadded and
    # Pallas masks the partial boundary block (rows are independent).
    B_rows = _round_up(max(B, 8), 8) if B < 512 else B
    if B_rows != B:
        x2d = jnp.pad(x2d, ((0, B_rows - B), (0, 0)))

    # Tile: <= 512 rows, and >= 2 grid steps whenever possible so the
    # "parallel" batch axis shards across both TensorCores on v7x.
    tm = min(512, max(8, _round_up(-(-B_rows // 2), 8)))
    grid = (pl.cdiv(B_rows, tm),)

    w1, slab, biases = packed["w1"], packed["slab"], packed["biases"]
    kernel = functools.partial(
        mlp_skip_kernel, h1=d["h1"], h2=d["h2"], h3=d["h3"],
        c1=d["c1"], r1=d["r1"], r2=d["r2"], nca=nca)

    # NOTE: pl.Buffered(1) on the three resident specs would free the unused
    # second weight buffer (~0.4 MiB); omitted for portability — headroom is
    # ample at the 24 MiB limit.  Output kept f32 for accuracy; switch the
    # out_shape dtype to bf16 if the consumer tolerates it (~5% less traffic).
    out_pad = pl.pallas_call(
        kernel,
        out_shape=jax.ShapeDtypeStruct((B_rows, nca), jnp.float32),
        grid=grid,
        in_specs=[
            pl.BlockSpec((tm, F), lambda i: (i, 0)),        # x tile (pipelined)
            pl.BlockSpec(w1.shape, lambda i: (0, 0)),       # W1, VMEM-resident
            pl.BlockSpec(slab.shape, lambda i: (0, 0)),     # small-weight slab
            pl.BlockSpec(biases.shape, lambda i: (0, 0)),   # bias pack
        ],
        out_specs=pl.BlockSpec((tm, nca), lambda i: (i, 0)),  # lane-dense output
        compiler_params=pltpu.CompilerParams(
            dimension_semantics=("parallel",),
            vmem_limit_bytes=24 << 20),
    )(x2d, w1, slab, biases)

    return out_pad[:B, :nc]


def init_params(key, num_features, h1, h2, h3, num_classes):
    """PyTorch-style uniform(+-1/sqrt(fan_in)) init, weights stored (in, out)."""
    def linear(k, fan_in, fan_out):
        kw, kb = jax.random.split(k)
        bound = 1.0 / np.sqrt(fan_in)
        w = jax.random.uniform(kw, (fan_in, fan_out), jnp.float32, -bound, bound)
        b = jax.random.uniform(kb, (fan_out,), jnp.float32, -bound, bound)
        return w, b

    k1, k2, k3, k4 = jax.random.split(key, 4)
    w1, b1 = linear(k1, num_features, h1)
    w2, b2 = linear(k2, h1, h2)
    w3, b3 = linear(k3, h1 + h2, h3)
    w4, b4 = linear(k4, h2 + h3, num_classes)
    return (w1, b1, w2, b2, w3, b3, w4, b4)


def reference_forward(x_nchw, raw):
    """Pure-JAX f32 reference matching the PyTorch module exactly."""
    w1, b1, w2, b2, w3, b3, w4, b4 = raw
    x = x_nchw.reshape(x_nchw.shape[0], -1)
    out1 = jnp.maximum(x @ w1 + b1, 0.0)
    out2 = jnp.maximum(out1 @ w2 + b2, 0.0)
    out3 = jnp.maximum(jnp.concatenate([out1, out2], axis=1) @ w3 + b3, 0.0)
    return jnp.concatenate([out2, out3], axis=1) @ w4 + b4


if __name__ == "__main__":
    # Module hyperparameters (small, consistent with the forward pass).
    B, C, H, W = 2, 4, 16, 16
    num_features = C * H * W          # 1024
    hidden_dim1, hidden_dim2, hidden_dim3 = 128, 64, 32
    num_classes = 10

    key = jax.random.PRNGKey(0)
    kx, kp = jax.random.split(key)
    x = jax.random.normal(kx, (B, C, H, W), jnp.float32)
    raw = init_params(kp, num_features, hidden_dim1, hidden_dim2,
                      hidden_dim3, num_classes)
    packed = pack_params(raw, num_classes)

    out = jax.block_until_ready(mlp_skip_forward(x, packed))
    ref = jax.block_until_ready(reference_forward(x, raw))

    assert out.shape == (B, num_classes)
    # bf16 weights/activations on the MXU path => relaxed tolerance vs. f32 ref.
    np.testing.assert_allclose(np.asarray(out), np.asarray(ref),
                               rtol=3e-2, atol=3e-2)
    print("KERNEL_OK")
</pallas_src>

<mosaic_0001>
module attributes {stable_mosaic.version = 11 : i64} {
  func.func @mlp_skip_kernel(%arg0: i32, %arg1: memref<8x1024xf32, #tpu.memory_space<vmem>>, %arg2: memref<1024x128xbf16, #tpu.memory_space<vmem>>, %arg3: memref<224x256xbf16, #tpu.memory_space<vmem>>, %arg4: memref<4x256xf32, #tpu.memory_space<vmem>>, %arg5: memref<8x128xf32, #tpu.memory_space<vmem>>) attributes {dimension_semantics = [#tpu.dimension_semantics<parallel>], iteration_bounds = array<i64: 1>, scalar_prefetch = 0 : i64, scratch_operands = 0 : i64, tpu.core_type = #tpu.core_type<tc>, window_params = [{transform_indices = @transform_0, window_bounds = array<i64: 8, 1024>}, {pipeline_mode = #tpu.pipeline_mode<synchronous>, transform_indices = @transform_1, window_bounds = array<i64: 1024, 128>}, {pipeline_mode = #tpu.pipeline_mode<synchronous>, transform_indices = @transform_2, window_bounds = array<i64: 224, 256>}, {pipeline_mode = #tpu.pipeline_mode<synchronous>, transform_indices = @transform_3, window_bounds = array<i64: 4, 256>}, {transform_indices = @transform_4, window_bounds = array<i64: 8, 128>}]} {
    %c0 = arith.constant 0 : index
    %c0_0 = arith.constant 0 : index
    %0 = vector.load %arg1[%c0, %c0_0] : memref<8x1024xf32, #tpu.memory_space<vmem>>, vector<8x1024xf32>
    %1 = arith.truncf %0 : vector<8x1024xf32> to vector<8x1024xbf16>
    %c0_1 = arith.constant 0 : index
    %c0_2 = arith.constant 0 : index
    %2 = vector.load %arg2[%c0_1, %c0_2] : memref<1024x128xbf16, #tpu.memory_space<vmem>>, vector<1024x128xbf16>
    %cst = arith.constant dense<0.000000e+00> : vector<8x128xf32>
    %3 = tpu.matmul %1, %2, %cst {dimension_numbers = #tpu.dot_dimension_numbers<[1], [0], [0], [1], [0, 0, 1, 1], [], []>} : vector<8x1024xbf16>, vector<1024x128xbf16>, vector<8x128xf32> -> vector<8x128xf32>
    %c0_3 = arith.constant 0 : index
    %c0_4 = arith.constant 0 : index
    %4 = vector.load %arg4[%c0_3, %c0_4] : memref<4x256xf32, #tpu.memory_space<vmem>>, vector<1x128xf32>
    %5 = vector.broadcast %4 : vector<1x128xf32> to vector<8x128xf32>
    %6 = arith.addf %3, %5 : vector<8x128xf32>
    %cst_5 = arith.constant 0.000000e+00 : f32
    %7 = vector.broadcast %cst_5 : f32 to vector<8x128xf32>
    %8 = arith.maximumf %6, %7 : vector<8x128xf32>
    %9 = arith.truncf %8 : vector<8x128xf32> to vector<8x128xbf16>
    %c0_6 = arith.constant 0 : index
    %c0_7 = arith.constant 0 : index
    %10 = vector.load %arg3[%c0_6, %c0_7] : memref<224x256xbf16, #tpu.memory_space<vmem>>, vector<128x256xbf16>
    %cst_8 = arith.constant dense<0.000000e+00> : vector<8x256xf32>
    %11 = tpu.matmul %9, %10, %cst_8 {dimension_numbers = #tpu.dot_dimension_numbers<[1], [0], [0], [1], [0, 0, 1, 1], [], []>} : vector<8x128xbf16>, vector<128x256xbf16>, vector<8x256xf32> -> vector<8x256xf32>
    %12 = vector.extract_strided_slice %11 {offsets = [0, 0], sizes = [8, 64], strides = [1, 1]} : vector<8x256xf32> to vector<8x64xf32>
    %c1 = arith.constant 1 : index
    %c0_9 = arith.constant 0 : index
    %13 = vector.load %arg4[%c1, %c0_9] : memref<4x256xf32, #tpu.memory_space<vmem>>, vector<1x64xf32>
    %14 = vector.broadcast %13 : vector<1x64xf32> to vector<8x64xf32>
    %15 = arith.addf %12, %14 : vector<8x64xf32>
    %cst_10 = arith.constant 0.000000e+00 : f32
    %16 = vector.broadcast %cst_10 : f32 to vector<8x64xf32>
    %17 = arith.maximumf %15, %16 : vector<8x64xf32>
    %18 = vector.extract_strided_slice %11 {offsets = [0, 128], sizes = [8, 32], strides = [1, 1]} : vector<8x256xf32> to vector<8x32xf32>
    %19 = arith.truncf %17 : vector<8x64xf32> to vector<8x64xbf16>
    %c128 = arith.constant 128 : index
    %c0_11 = arith.constant 0 : index
    %20 = vector.load %arg3[%c128, %c0_11] : memref<224x256xbf16, #tpu.memory_space<vmem>>, vector<64x256xbf16>
    %cst_12 = arith.constant dense<0.000000e+00> : vector<8x256xf32>
    %21 = tpu.matmul %19, %20, %cst_12 {dimension_numbers = #tpu.dot_dimension_numbers<[1], [0], [0], [1], [0, 0, 1, 1], [], []>} : vector<8x64xbf16>, vector<64x256xbf16>, vector<8x256xf32> -> vector<8x256xf32>
    %22 = vector.extract_strided_slice %21 {offsets = [0, 128], sizes = [8, 32], strides = [1, 1]} : vector<8x256xf32> to vector<8x32xf32>
    %23 = arith.addf %18, %22 : vector<8x32xf32>
    %c2 = arith.constant 2 : index
    %c128_13 = arith.constant 128 : index
    %24 = vector.load %arg4[%c2, %c128_13] : memref<4x256xf32, #tpu.memory_space<vmem>>, vector<1x32xf32>
    %25 = vector.broadcast %24 : vector<1x32xf32> to vector<8x32xf32>
    %26 = arith.addf %23, %25 : vector<8x32xf32>
    %cst_14 = arith.constant 0.000000e+00 : f32
    %27 = vector.broadcast %cst_14 : f32 to vector<8x32xf32>
    %28 = arith.maximumf %26, %27 : vector<8x32xf32>
    %29 = vector.extract_strided_slice %21 {offsets = [0, 0], sizes = [8, 128], strides = [1, 1]} : vector<8x256xf32> to vector<8x128xf32>
    %30 = arith.truncf %28 : vector<8x32xf32> to vector<8x32xbf16>
    %c192 = arith.constant 192 : index
    %c0_15 = arith.constant 0 : index
    %31 = vector.load %arg3[%c192, %c0_15] : memref<224x256xbf16, #tpu.memory_space<vmem>>, vector<32x128xbf16>
    %cst_16 = arith.constant dense<0.000000e+00> : vector<8x128xf32>
    %32 = tpu.matmul %30, %31, %cst_16 {dimension_numbers = #tpu.dot_dimension_numbers<[1], [0], [0], [1], [0, 0, 1, 1], [], []>} : vector<8x32xbf16>, vector<32x128xbf16>, vector<8x128xf32> -> vector<8x128xf32>
    %33 = arith.addf %32, %29 : vector<8x128xf32>
    %c3 = arith.constant 3 : index
    %c0_17 = arith.constant 0 : index
    %34 = vector.load %arg4[%c3, %c0_17] : memref<4x256xf32, #tpu.memory_space<vmem>>, vector<1x128xf32>
    %35 = vector.broadcast %34 : vector<1x128xf32> to vector<8x128xf32>
    %36 = arith.addf %33, %35 : vector<8x128xf32>
    %c0_18 = arith.constant 0 : index
    %c0_19 = arith.constant 0 : index
    %37 = vector.load %arg5[%c0_18, %c0_19] : memref<8x128xf32, #tpu.memory_space<vmem>>, vector<8x128xf32>
    tpu.vector_store %arg5[%c0_18, %c0_19], %36 {strides = array<i32>} : memref<8x128xf32, #tpu.memory_space<vmem>>, vector<8x128xf32>,
    return
  }
  func.func @transform_0(%arg0: i32) -> (i32, i32) {
    %c0_i32 = arith.constant 0 : i32
    %c0_i32_0 = arith.constant 0 : i32
    return %arg0, %c0_i32 : i32, i32
  }
  func.func @transform_1(%arg0: i32) -> (i32, i32) {
    %c0_i32 = arith.constant 0 : i32
    %c0_i32_0 = arith.constant 0 : i32
    %c0_i32_1 = arith.constant 0 : i32
    return %c0_i32, %c0_i32_0 : i32, i32
  }
  func.func @transform_2(%arg0: i32) -> (i32, i32) {
    %c0_i32 = arith.constant 0 : i32
    %c0_i32_0 = arith.constant 0 : i32
    %c0_i32_1 = arith.constant 0 : i32
    return %c0_i32, %c0_i32_0 : i32, i32
  }
  func.func @transform_3(%arg0: i32) -> (i32, i32) {
    %c0_i32 = arith.constant 0 : i32
    %c0_i32_0 = arith.constant 0 : i32
    %c0_i32_1 = arith.constant 0 : i32
    return %c0_i32, %c0_i32_0 : i32, i32
  }
  func.func @transform_4(%arg0: i32) -> (i32, i32) {
    %c0_i32 = arith.constant 0 : i32
    %c0_i32_0 = arith.constant 0 : i32
    return %arg0, %c0_i32 : i32, i32
  }
}

</mosaic_0001>

<bundles_post_ra>
// kernel: tpu_custom_call.1
= control target key start
LH: loop header
LB: loop body
LE: loop exit
PB: predicated region body
PF: predicated region fallthrough
CT: control target
= control target key end

     0   :  { %9 = vsyncpa [#allocation3], 0  ;;  %s1565_s0 = inlined_call_operand.hbm [shape: f32[8,1024], index: 0, kind: input, shape index: {}]   ;;  %s1566_s1 = inlined_call_operand.hbm [shape: bf16[1024,128], index: 1, kind: input, shape index: {}]   ;;  %s1567_s2 = inlined_call_operand.hbm [shape: bf16[224,256], index: 2, kind: input, shape index: {}]   ;;  %s1568_s3 = inlined_call_operand.hbm [shape: f32[4,256], index: 3, kind: input, shape index: {}]   ;;  %s1569_s4 = inlined_call_operand.hbm [shape: f32[8,128], index: 4, kind: output, shape index: {}]  }
   0x1   :  { %10 = vsyncpa [#allocation6], 0 }
   0x2   :  { %11 = vsyncpa [#allocation9], 0 }
   0x3   :  { %12 = vsyncpa [#allocation4], 0  ;;  %s1513_s15 = smov [#allocation5]  }
   0x4   :  { %s28_s16 = sshll.u32 %s1513_s15, 4  ;;  %s29_s16 = int_to_ptr.vmem [resolvable:$true] %s28_s16 }
   0x5   :  { %s1413_s17 = scalar_lea.vmem %s29_s16, 8192  ;;  %p1418_p1 = scmp.lt.s32.totalorder %s29_s16, %s29_s16 }
   0x6   :  { %p1414_p0 = scmp.ne.s32.totalorder %s29_s16, %s1413_s17  ;;  %p1419_p2 = scmp.lt.s32.totalorder %s1413_s17, %s1413_s17 }
   0x8   :  { %p1420_p3 = por %p1419_p2, %p1418_p1 }
   0xa   :  { %p1421_p4 = pnand %p1420_p3, %p1414_p0 }
   0xc   :  { %1424 = shalt.err (!%p1421_p4)
}
   0xd   :  { %s1514_s18 = smov 64   ;;  %s1515_s19 = smov 4  }
   0xe   :  { %34 = dma.hbm_to_vmem [thread:$0]  %s1566_s1, 8192, %s29_s16, [#allocation6], %s1514_s18, %s1514_s18, %s1515_s19  }
   0xf   :  { %s1516_s22 = smov [#allocation2]   ;;  %s1517_s24 = smov [#allocation7]  }
  0x10   :  { %s19_s23 = sshll.u32 %s1516_s22, 4  ;;  %s40_s25 = sshll.u32 %s1517_s24, 4  ;;  %s20_s23 = int_to_ptr.vmem [resolvable:$true] %s19_s23  ;;  %s41_s25 = int_to_ptr.vmem [resolvable:$true] %s40_s25 }
  0x11   :  { %s1433_s26 = scalar_lea.vmem %s20_s23, 1024  ;;  %p1438_p6 = scmp.lt.s32.totalorder %s20_s23, %s20_s23 }
  0x12   :  { %p1434_p5 = scmp.ne.s32.totalorder %s20_s23, %s1433_s26  ;;  %p1439_p7 = scmp.lt.s32.totalorder %s1433_s26, %s1433_s26 }
  0x14   :  { %p1440_p8 = por %p1439_p7, %p1438_p6 }
  0x16   :  { %p1441_p9 = pnand %p1440_p8, %p1434_p5 }
  0x18   :  { %1444 = shalt.err (!%p1441_p9)
}
  0x19   :  { %22 = dma.hbm_to_vmem [thread:$0]  %s1565_s0, 1024, %s20_s23, [#allocation3]  }
  0x1a   :  { %s1453_s29 = scalar_lea.vmem %s41_s25, 3584  ;;  %p1458_p11 = scmp.lt.s32.totalorder %s41_s25, %s41_s25 }
  0x1b   :  { %p1454_p10 = scmp.ne.s32.totalorder %s41_s25, %s1453_s29  ;;  %p1459_p12 = scmp.lt.s32.totalorder %s1453_s29, %s1453_s29 }
  0x1d   :  { %p1460_p13 = por %p1459_p12, %p1458_p11 }
  0x1f   :  { %p1461_p0 = pnand %p1460_p13, %p1454_p10 }
  0x21   :  { %1464 = shalt.err (!%p1461_p0)
}
  0x22   :  { %s1518_s1 = smov 128   ;;  %s1519_s30 = smov 8  }
  0x23   :  { %46 = dma.hbm_to_vmem [thread:$0]  %s1567_s2, 3584, %s41_s25, [#allocation6], %s1518_s1, %s1518_s1, %s1519_s30  }
  0x24   :  { %s1520_s7 = smov [#allocation8]  }
  0x25   :  { %s53_s8 = sshll.u32 %s1520_s7, 4  ;;  %s54_s8 = int_to_ptr.vmem [resolvable:$true] %s53_s8 }
  0x26   :  { %s1473_s9 = scalar_lea.vmem %s54_s8, 128  ;;  %p1478_p2 = scmp.lt.s32.totalorder %s54_s8, %s54_s8 }
  0x27   :  { %p1474_p1 = scmp.ne.s32.totalorder %s54_s8, %s1473_s9  ;;  %p1479_p3 = scmp.lt.s32.totalorder %s1473_s9, %s1473_s9 }
  0x29   :  { %p1480_p4 = por %p1479_p3, %p1478_p2 }
  0x2b   :  { %p1481_p5 = pnand %p1480_p4, %p1474_p1 }
  0x2d   :  { %1484 = shalt.err (!%p1481_p5)
}
  0x2e   :  { %56 = dma.hbm_to_vmem [thread:$0]  %s1568_s3, 128, %s54_s8, [#allocation9]  }
  0x2f   :  { %1505 = dma.done.wait [#allocation3], 1024  }
  0x30   :  { %1506 = vsyncadd [#allocation3], 4294966272 }
  0x31   :  { %1507 = dma.done.wait [#allocation6], 11776  }
  0x32   :  { %1508 = vsyncadd [#allocation6], 4294955520 }
  0x33   :  { %1509 = dma.done.wait [#allocation9], 128  }
  0x34   :  { %1510 = vsyncadd [#allocation9], 4294967168  ;;  %v1303_v0 = vld [vmem:[#allocation5 + $0x78] sm:$0xff]   ;;  %v1307_v4 = vld [vmem:[#allocation5 + $0x70] sm:$0xff]   ;;  %vm958_vm0 = vcmask 523264   ;;  %vm1523_vm1 = vmmov 0  }
  0x35   :  { %v1304_v1 = vld [vmem:[#allocation5 + $0xf8] sm:$0xff]   ;;  %1192 = vmatprep.subr.bf16.mxu0 %v1303_v0  ;;  %v1308_v5 = vld [vmem:[#allocation5 + $0xf0] sm:$0xff]   ;;  %v1311_v8 = vld [vmem:[#allocation5 + $0x68] sm:$0xff]   ;;  %vm1028_vm2 = vcmask 261120   ;;  %s1524_s2 = smov [#allocation10]  }
  0x36   :  { %v1305_v2 = vld [vmem:[#allocation5 + $0x38] sm:$0xff]   ;;  %1214 = vmatprep.subr.bf16.mxu1 %v1304_v1  ;;  %v1309_v6 = vld [vmem:[#allocation5 + $0x30] sm:$0xff]   ;;  %v1312_v9 = vld [vmem:[#allocation5 + $0xe8] sm:$0xff]   ;;  %s1085_s3 = sshll.u32 %s1524_s2, 4  ;;  %s1086_s3 = int_to_ptr.vmem [resolvable:$true] %s1085_s3 }
  0x37   :  { %v1306_v3 = vld [vmem:[#allocation5 + $0xb8] sm:$0xff]   ;;  %1193 = vmatpush3.bf16.msra.mxu0 %v1305_v2  ;;  %v1310_v7 = vld [vmem:[#allocation5 + $0xb0] sm:$0xff]   ;;  %v1313_v10 = vld [vmem:[#allocation5 + $0x28] sm:$0xff]   ;;  %s1485_s11 = scalar_lea.vmem %s1086_s3, 128  ;;  %p1490_p7 = scmp.lt.s32.totalorder %s1086_s3, %s1086_s3 }
  0x38   :  { %1215 = vmatpush3.bf16.msra.mxu1 %v1306_v3  ;;  %1194 = vmatprep.subr.bf16.mxu0 %v1307_v4  ;;  %v1314_v11 = vld [vmem:[#allocation5 + $0xa8] sm:$0xff]   ;;  %v1315_v12 = vld [vmem:[#allocation5 + $0x60] sm:$0xff]   ;;  %v1319_v16 = vld [vmem:[#allocation5 + $0x58] sm:$0xff]   ;;  %p1486_p6 = scmp.ne.s32.totalorder %s1086_s3, %s1485_s11  ;;  %p1491_p8 = scmp.lt.s32.totalorder %s1485_s11, %s1485_s11 }
  0x39   :  { %1216 = vmatprep.subr.bf16.mxu1 %v1308_v5  ;;  %v1316_v13 = vld [vmem:[#allocation5 + $0xe0] sm:$0xff]   ;;  %v1320_v17 = vld [vmem:[#allocation5 + $0xd8] sm:$0xff]   ;;  %v1323_v20 = vld [vmem:[#allocation5 + $0x50] sm:$0xff]  }
  0x3a   :  { %v1317_v14 = vld [vmem:[#allocation5 + $0x20] sm:$0xff]   ;;  %v1321_v18 = vld [vmem:[#allocation5 + $0x18] sm:$0xff]   ;;  %v1324_v21 = vld [vmem:[#allocation5 + $0xd0] sm:$0xff]   ;;  %p1492_p9 = por %p1491_p8, %p1490_p7 }
  0x3b   :  { %1195 = vmatpush3.bf16.msra.mxu0 %v1309_v6  ;;  %v1318_v15 = vld [vmem:[#allocation5 + $0xa0] sm:$0xff]   ;;  %v1322_v19 = vld [vmem:[#allocation5 + $0x98] sm:$0xff]   ;;  %v1325_v22 = vld [vmem:[#allocation5 + $0x10] sm:$0xff]  }
  0x3c   :  { %1217 = vmatpush3.bf16.msra.mxu1 %v1310_v7  ;;  %1196 = vmatprep.subr.bf16.mxu0 %v1311_v8  ;;  %v1326_v23 = vld [vmem:[#allocation5 + $0x90] sm:$0xff]   ;;  %v1327_v24 = vld [vmem:[#allocation5 + $0x48] sm:$0xff]   ;;  %v1331_v28 = vld [vmem:[#allocation5 + $0x40] sm:$0xff]   ;;  %p1493_p10 = pnand %p1492_p9, %p1486_p6 }
  0x3d   :  { %1218 = vmatprep.subr.bf16.mxu1 %v1312_v9  ;;  %v1328_v25 = vld [vmem:[#allocation5 + $0xc8] sm:$0xff]   ;;  %v1332_v29 = vld [vmem:[#allocation5 + $0xc0] sm:$0xff]   ;;  %v73_v33 = vld [vmem:[#allocation2 + $0x18] sm:$0xff] }
  0x3e   :  { %v1329_v26 = vld [vmem:[#allocation5 + $0x8] sm:$0xff]   ;;  %v1333_v30 = vld [vmem:[#allocation5] sm:$0xff]   ;;  %v81_v36 = vpack.c.bf16 %v73_v33, %v73_v33  ;;  %v72_v38 = vld [vmem:[#allocation2 + $0x10] sm:$0xff] }
  0x3f   :  { %1197 = vmatpush3.bf16.msra.mxu0 %v1313_v10  ;;  %v1330_v27 = vld [vmem:[#allocation5 + $0x88] sm:$0xff]   ;;  %v1334_v31 = vld [vmem:[#allocation5 + $0x80] sm:$0xff]   ;;  %v80_v39 = vpack.c.bf16 %v72_v38, %v72_v38  ;;  %v1335_v40 = vld [vmem:[#allocation5 + $0x178] sm:$0xff]  }
  0x40   :  { %1219 = vmatpush3.bf16.msra.mxu1 %v1314_v11  ;;  %1198 = vmatprep.subr.bf16.mxu0 %v1315_v12  ;;  %v71_v32 = vld [vmem:[#allocation2 + $0x8] sm:$0xff]  ;;  %v70_v34 = vld [vmem:[#allocation2] sm:$0xff]  ;;  %v1336_v41 = vld [vmem:[#allocation5 + $0x1f8] sm:$0xff]  }
  0x41   :  { %1220 = vmatprep.subr.bf16.mxu1 %v1316_v13  ;;  %v79_v35 = vpack.c.bf16 %v71_v32, %v71_v32  ;;  %v78_v37 = vpack.c.bf16 %v70_v34, %v70_v34  ;;  %675 = vmatprep.mubr.bf16.mxu1 %v81_v36  ;;  %v1337_v42 = vld [vmem:[#allocation5 + $0x138] sm:$0xff]   ;;  %v1339_v44 = vld [vmem:[#allocation5 + $0x170] sm:$0xff]   ;;  %v1343_v48 = vld [vmem:[#allocation5 + $0x168] sm:$0xff]   ;;  %v1521_v32 = vmov 0  }
  0x42   :  { %v1338_v43 = vld [vmem:[#allocation5 + $0x1b8] sm:$0xff]   ;;  %v1340_v45 = vld [vmem:[#allocation5 + $0x1f0] sm:$0xff]   ;;  %v1344_v49 = vld [vmem:[#allocation5 + $0x1e8] sm:$0xff]  }
  0x43   :  { %1199 = vmatpush3.bf16.msra.mxu0 %v1317_v14  ;;  %635 = vmatprep.mubr.bf16.mxu0 %v79_v35  ;;  %v1341_v46 = vld [vmem:[#allocation5 + $0x130] sm:$0xff]   ;;  %v1345_v50 = vld [vmem:[#allocation5 + $0x128] sm:$0xff]   ;;  %v1347_v52 = vld [vmem:[#allocation5 + $0x160] sm:$0xff]  }
  0x44   :  { %1221 = vmatpush3.bf16.msra.mxu1 %v1318_v15  ;;  %1200 = vmatprep.subr.bf16.mxu0 %v1319_v16  ;;  %v1342_v47 = vld [vmem:[#allocation5 + $0x1b0] sm:$0xff]   ;;  %v1346_v51 = vld [vmem:[#allocation5 + $0x1a8] sm:$0xff]   ;;  %v1348_v53 = vld [vmem:[#allocation5 + $0x1e0] sm:$0xff]  }
  0x45   :  { %1222 = vmatprep.subr.bf16.mxu1 %v1320_v17  ;;  %v1349_v54 = vld [vmem:[#allocation5 + $0x120] sm:$0xff]   ;;  %v1351_v56 = vld [vmem:[#allocation5 + $0x158] sm:$0xff]   ;;  %v1355_v60 = vld [vmem:[#allocation5 + $0x150] sm:$0xff]  }
  0x46   :  { %v1350_v55 = vld [vmem:[#allocation5 + $0x1a0] sm:$0xff]   ;;  %v1352_v57 = vld [vmem:[#allocation5 + $0x1d8] sm:$0xff]   ;;  %v1356_v61 = vld [vmem:[#allocation5 + $0x1d0] sm:$0xff]  }
  0x47   :  { %1201 = vmatpush3.bf16.msra.mxu0 %v1321_v18  ;;  %v1353_v58 = vld [vmem:[#allocation5 + $0x118] sm:$0xff]   ;;  %v1357_v62 = vld [vmem:[#allocation5 + $0x110] sm:$0xff]   ;;  %v1359_v0 = vld [vmem:[#allocation5 + $0x148] sm:$0xff]  }
  0x48   :  { %1223 = vmatpush3.bf16.msra.mxu1 %v1322_v19  ;;  %1202 = vmatprep.subr.bf16.mxu0 %v1323_v20  ;;  %v1354_v59 = vld [vmem:[#allocation5 + $0x198] sm:$0xff]   ;;  %v1358_v63 = vld [vmem:[#allocation5 + $0x190] sm:$0xff]   ;;  %v1360_v1 = vld [vmem:[#allocation5 + $0x1c8] sm:$0xff]  }
  0x49   :  { %1224 = vmatprep.subr.bf16.mxu1 %v1324_v21  ;;  %v1361_v2 = vld [vmem:[#allocation5 + $0x108] sm:$0xff]   ;;  %v1363_v4 = vld [vmem:[#allocation5 + $0x140] sm:$0xff]   ;;  %v77_v9 = vld [vmem:[#allocation2 + $0x38] sm:$0xff] }
  0x4a   :  { %v1362_v3 = vld [vmem:[#allocation5 + $0x188] sm:$0xff]   ;;  %v1364_v5 = vld [vmem:[#allocation5 + $0x1c0] sm:$0xff]   ;;  %v85_v11 = vpack.c.bf16 %v77_v9, %v77_v9  ;;  %v76_v13 = vld [vmem:[#allocation2 + $0x30] sm:$0xff] }
  0x4b   :  { %1203 = vmatpush3.bf16.msra.mxu0 %v1325_v22  ;;  %v1365_v6 = vld [vmem:[#allocation5 + $0x100] sm:$0xff]   ;;  %v75_v8 = vld [vmem:[#allocation2 + $0x28] sm:$0xff]  ;;  %v84_v15 = vpack.c.bf16 %v76_v13, %v76_v13  ;;  %v1367_v16 = vld [vmem:[#allocation7 + $0x70] ss:$8 sps:$4 sm:$0xff]   ;;  %v1522_v13 = vmov 0.0  }
  0x4c   :  { %1225 = vmatpush3.bf16.msra.mxu1 %v1326_v23  ;;  %1204 = vmatprep.subr.bf16.mxu0 %v1327_v24  ;;  %v1366_v7 = vld [vmem:[#allocation5 + $0x180] sm:$0xff]   ;;  %v83_v10 = vpack.c.bf16 %v75_v8, %v75_v8  ;;  %v1369_v17 = vld [vmem:[#allocation7 + $0x74] ss:$8 sps:$4 sm:$0xff]   ;;  %v1373_v21 = vld [vmem:[#allocation7 + $0x50] ss:$8 sps:$4 sm:$0xff]  }
  0x4d   :  { %1226 = vmatprep.subr.bf16.mxu1 %v1328_v25  ;;  %v74_v12 = vld [vmem:[#allocation2 + $0x20] sm:$0xff]  ;;  %v1375_v20 = vld [vmem:[#allocation7 + $0x54] ss:$8 sps:$4 sm:$0xff]   ;;  %v1379_v25 = vld [vmem:[#allocation7 + $0x30] ss:$8 sps:$4 sm:$0xff]  }
  0x4e   :  { %v82_v14 = vpack.c.bf16 %v74_v12, %v74_v12  ;;  %v1372_v18 = vld [vmem:[#allocation7 + $0x64] ss:$8 sps:$4 sm:$0xff]   ;;  %v1370_v19 = vld [vmem:[#allocation7 + $0x60] ss:$8 sps:$4 sm:$0xff]   ;;  %v1381_v24 = vld [vmem:[#allocation7 + $0x34] ss:$8 sps:$4 sm:$0xff]  }
  0x4f   :  { %1205 = vmatpush3.bf16.msra.mxu0 %v1329_v26  ;;  %v1378_v22 = vld [vmem:[#allocation7 + $0x44] ss:$8 sps:$4 sm:$0xff]   ;;  %v1376_v23 = vld [vmem:[#allocation7 + $0x40] ss:$8 sps:$4 sm:$0xff]   ;;  %v1391_v33 = vld [vmem:[#allocation7 + $0xb0] ss:$8 sps:$4 sm:$0xff]  }
  0x50   :  { %1227 = vmatpush3.bf16.msra.mxu1 %v1330_v27  ;;  %1206 = vmatprep.subr.bf16.mxu0 %v1331_v28  ;;  %v1384_v26 = vld [vmem:[#allocation7 + $0x24] ss:$8 sps:$4 sm:$0xff]   ;;  %v1382_v27 = vld [vmem:[#allocation7 + $0x20] ss:$8 sps:$4 sm:$0xff]   ;;  %v1387_v28 = vld [vmem:[#allocation7 + $0x14] ss:$8 sps:$4 sm:$0xff]  }
  0x51   :  { %1228 = vmatprep.subr.bf16.mxu1 %v1332_v29  ;;  %v1385_v29 = vld [vmem:[#allocation7 + $0x10] ss:$8 sps:$4 sm:$0xff]   ;;  %v1393_v34 = vld [vmem:[#allocation7 + $0xb4] ss:$8 sps:$4 sm:$0xff]   ;;  %v1396_v35 = vld [vmem:[#allocation7 + $0xa4] ss:$8 sps:$4 sm:$0xff]  }
  0x52   :  { %v1394_v36 = vld [vmem:[#allocation7 + $0xa0] ss:$8 sps:$4 sm:$0xff]   ;;  %v1397_v38 = vld [vmem:[#allocation7 + $0x90] ss:$8 sps:$4 sm:$0xff]  }
  0x53   :  { %1207 = vmatpush3.bf16.msra.mxu0 %v1333_v30  ;;  %v1390_v30 = vld [vmem:[#allocation7 + $0x4] ss:$8 sps:$4 sm:$0xff]   ;;  %v1403_v12 = vld [vmem:[#allocation7 + $0xd0] ss:$8 sps:$4 sm:$0xff]  }
  0x54   :  { %1229 = vmatpush3.bf16.msra.mxu1 %v1334_v31  ;;  %1236 = vmatprep.subr.bf16.mxu0 %v1335_v40  ;;  %v1388_v31 = vld [vmem:[#allocation7] ss:$8 sps:$4 sm:$0xff]  }
  0x55   :  { %1258 = vmatprep.subr.bf16.mxu1 %v1336_v41 }
  0x56   :  { %636 = vmatmul.mubr.bf16.vlgmr.msra.gmra.mxu0 %v78_v37  ;;  %v1399_v37 = vld [vmem:[#allocation7 + $0x94] ss:$8 sps:$4 sm:$0xff]  }
  0x57   :  { %676 = vmatmul.mubr.bf16.vlgmr.msra.gmra.mxu1 %v80_v39  ;;  %1237 = vmatpush3.bf16.msra.mxu0 %v1337_v42 }
  0x58   :  { %1259 = vmatpush3.bf16.msra.mxu1 %v1338_v43  ;;  %1238 = vmatprep.subr.bf16.mxu0 %v1339_v44 }
  0x59   :  { %1260 = vmatprep.subr.bf16.mxu1 %v1340_v45  ;;  %715 = vmatprep.mubr.bf16.mxu0 %v83_v10 }
  0x5a   :  { %755 = vmatprep.mubr.bf16.mxu1 %v85_v11 }
  0x5b   :  { %1239 = vmatpush3.bf16.msra.mxu0 %v1341_v46 }
  0x5c   :  { %1261 = vmatpush3.bf16.msra.mxu1 %v1342_v47  ;;  %1240 = vmatprep.subr.bf16.mxu0 %v1343_v48  ;;  %v1096_v48 = vld [vmem:[#allocation8] ss:$0 sm:$0xff] }
  0x5d   :  { %1262 = vmatprep.subr.bf16.mxu1 %v1344_v49 }
  0x5f   :  { %1241 = vmatpush3.bf16.msra.mxu0 %v1345_v50 }
  0x60   :  { %1263 = vmatpush3.bf16.msra.mxu1 %v1346_v51  ;;  %1242 = vmatprep.subr.bf16.mxu0 %v1347_v52 }
  0x61   :  { %1264 = vmatprep.subr.bf16.mxu1 %v1348_v53 }
  0x63   :  { %1243 = vmatpush3.bf16.msra.mxu0 %v1349_v54 }
  0x64   :  { %1265 = vmatpush3.bf16.msra.mxu1 %v1350_v55  ;;  %1244 = vmatprep.subr.bf16.mxu0 %v1351_v56 }
  0x65   :  { %1266 = vmatprep.subr.bf16.mxu1 %v1352_v57 }
  0x67   :  { %1245 = vmatpush3.bf16.msra.mxu0 %v1353_v58 }
  0x68   :  { %1267 = vmatpush3.bf16.msra.mxu1 %v1354_v59  ;;  %1246 = vmatprep.subr.bf16.mxu0 %v1355_v60 }
  0x69   :  { %1268 = vmatprep.subr.bf16.mxu1 %v1356_v61 }
  0x6b   :  { %1247 = vmatpush3.bf16.msra.mxu0 %v1357_v62 }
  0x6c   :  { %1269 = vmatpush3.bf16.msra.mxu1 %v1358_v63  ;;  %1248 = vmatprep.subr.bf16.mxu0 %v1359_v0 }
  0x6d   :  { %1270 = vmatprep.subr.bf16.mxu1 %v1360_v1 }
  0x6f   :  { %1249 = vmatpush3.bf16.msra.mxu0 %v1361_v2  ;;  %v1402_v2 = vld [vmem:[#allocation7 + $0x84] ss:$8 sps:$4 sm:$0xff]  }
  0x70   :  { %1271 = vmatpush3.bf16.msra.mxu1 %v1362_v3  ;;  %1250 = vmatprep.subr.bf16.mxu0 %v1363_v4  ;;  %v1400_v3 = vld [vmem:[#allocation7 + $0x80] ss:$8 sps:$4 sm:$0xff]  }
  0x71   :  { %1272 = vmatprep.subr.bf16.mxu1 %v1364_v5  ;;  %v1177_v4 = vld [vmem:[#allocation8 + $0x1] ss:$0 sm:$0xff] }
  0x73   :  { %1251 = vmatpush3.bf16.msra.mxu0 %v1365_v6 }
  0x74   :  { %1273 = vmatpush3.bf16.msra.mxu1 %v1366_v7  ;;  %861 = vmatprep.subr.bf16.mxu0 %v1369_v17  ;;  %v1187_v17 = vld [vmem:[#allocation8 + $0x6] ss:$0 sm:$0xff] }
  0x75   :  { %970 = vmatprep.subr.bf16.mxu1 %v1393_v34 }
  0x76   :  { %716 = vmatmul.mubr.bf16.vlgmr.msra.gmra.mxu0 %v82_v14  ;;  %v1404_v14 = vld [vmem:[#allocation7 + $0xc0] ss:$8 sps:$4 sm:$0xff]  }
  0x77   :  { %756 = vmatmul.mubr.bf16.vlgmr.msra.gmra.mxu1 %v84_v15  ;;  %862 = vmatpush1.bf16.msra.mxu0 %v1367_v16 }
  0x78   :  { %863 = vmatprep.subr.bf16.mxu0 %v1372_v18  ;;  %893 = vmatprep.mubr.bf16.mxu0 %v1521_v32 }
  0x79   :  { %994 = vmatprep.mubr.bf16.mxu1 %v1521_v32  ;;  %971 = vmatpush1.bf16.msra.mxu1 %v1391_v33 }
  0x7a   :  { %972 = vmatprep.subr.bf16.mxu1 %v1396_v35 }
  0x7b   :  { %864 = vmatpush1.bf16.msra.mxu0 %v1370_v19 }
  0x7c   :  { %865 = vmatprep.subr.bf16.mxu0 %v1375_v20 }
  0x7d   :  { %973 = vmatpush1.bf16.msra.mxu1 %v1394_v36 }
  0x7e   :  { %974 = vmatprep.subr.bf16.mxu1 %v1399_v37 }
  0x7f   :  { %866 = vmatpush1.bf16.msra.mxu0 %v1373_v21 }
  0x80   :  { %867 = vmatprep.subr.bf16.mxu0 %v1378_v22 }
  0x81   :  { %975 = vmatpush1.bf16.msra.mxu1 %v1397_v38 }
  0x82   :  { %976 = vmatprep.subr.bf16.mxu1 %v1402_v2 }
  0x83   :  { %868 = vmatpush1.bf16.msra.mxu0 %v1376_v23 }
  0x84   :  { %869 = vmatprep.subr.bf16.mxu0 %v1381_v24 }
  0x85   :  { %977 = vmatpush1.bf16.msra.mxu1 %v1400_v3 }
  0x86   :  { %1283 = vmatprep.subr.bf16.mxu1 %v1522_v13 }
  0x87   :  { %870 = vmatpush1.bf16.msra.mxu0 %v1379_v25  ;;  %v1191_v25 = vld [vmem:[#allocation8 + $0x3] ss:$0 sm:$0xff] }
  0x88   :  { %871 = vmatprep.subr.bf16.mxu0 %v1384_v26 }
  0x8b   :  { %872 = vmatpush1.bf16.msra.mxu0 %v1382_v27 }
  0x8c   :  { %873 = vmatprep.subr.bf16.mxu0 %v1387_v28 }
  0x8f   :  { %874 = vmatpush1.bf16.msra.mxu0 %v1385_v29 }
  0x90   :  { %875 = vmatprep.subr.bf16.mxu0 %v1390_v30 }
  0x93   :  { %876 = vmatpush1.bf16.msra.mxu0 %v1388_v31 }
 0x116   :  { %v1208_v39 = vpop.f32.mrf.mxu0 }
 0x117   :  { %v1230_v40 = vpop.f32.mrf.mxu1 }
 0x118   :  { %v1209_v41 = vpop.f32.mrf.mxu0 }
 0x119   :  { %v1231_v42 = vpop.f32.mrf.mxu1  ;;  %v1210_v47 = vadd.f32 %v1209_v41, %v1208_v39 }
 0x11a   :  { %v1211_v43 = vpop.f32.mrf.mxu0  ;;  %v1232_v50 = vadd.f32 %v1231_v42, %v1230_v40 }
 0x11b   :  { %v1233_v44 = vpop.f32.mrf.mxu1  ;;  %v638_v49 = vadd.f32 %v1210_v47, %v1096_v48 }
 0x11c   :  { %v1212_v45 = vpop.f32.mrf.mxu0 }
 0x11d   :  { %v1234_v46 = vpop.f32.mrf.mxu1  ;;  %v678_v54 = vadd.f32 %v1232_v50, %v638_v49 }
 0x136   :  { %v1252_v51 = vpop.f32.mrf.mxu0 }
 0x137   :  { %v1274_v52 = vpop.f32.mrf.mxu1 }
 0x138   :  { %v1253_v53 = vpop.f32.mrf.mxu0 }
 0x139   :  { %v1254_v55 = vadd.f32 %v1253_v53, %v1252_v51  ;;  %v1275_v56 = vpop.f32.mrf.mxu1 }
 0x13a   :  { %v1255_v57 = vpop.f32.mrf.mxu0  ;;  %v1276_v59 = vadd.f32 %v1275_v56, %v1274_v52 }
 0x13b   :  { %v718_v58 = vadd.f32 %v1254_v55, %v678_v54  ;;  %v1277_v60 = vpop.f32.mrf.mxu1 }
 0x13c   :  { %v1256_v61 = vpop.f32.mrf.mxu0 }
 0x13d   :  { %v758_v62 = vadd.f32 %v1276_v59, %v718_v58  ;;  %v1278_v63 = vpop.f32.mrf.mxu1 }
 0x13f   :  { %v763_v0 = vmax.f32 %v758_v62, 0.0 }
 0x141   :  { %v764_v1 = vpack.c.bf16 %v763_v0, %v763_v0 }
 0x143   :  { %894 = vmatmul.mubr.bf16.vlgmr.msra.gmra.mxu0 %v764_v1 }
 0x203   :  { %v895_v5 = vpop.f32.mrf.mxu0 }
 0x204   :  { %v907_v6 = vadd.f32 %v1177_v4, %v895_v5 }
 0x205   :  { %v897_v7 = vpop.f32.mrf.mxu0 }
 0x206   :  { %v908_v8 = vmax.f32 %v907_v6, 0.0 }
 0x207   :  { %v899_v9 = vpop.f32.mrf.mxu0 }
 0x208   :  { %v909_v10 = vpack.c.bf16 %v908_v8, %v908_v8 }
 0x209   :  { %v900_v11 = vpop.f32.mrf.mxu0 }
 0x20a   :  { %1186 = vmatmul.mubr.msk.bf16.vlgmr.msra.gmra.mxu1 %vm958_vm0, %v909_v10 }
 0x20b   :  { %1284 = vmatpush3.bf16.msra.mxu1 %v1403_v12  ;;  %1287 = vmatprep.mubr.msk.bf16.mxu1 %vm1523_vm1, %v1522_v13 }
 0x20c   :  { %1285 = vmatprep.subr.bf16.mxu1 %v1522_v13 }
 0x20f   :  { %1286 = vmatpush3.bf16.msra.mxu1 %v1404_v14 }
 0x2ca   :  { %v996_v15 = vpop.f32.mrf.mxu1 }
 0x2cc   :  { %v998_v16 = vpop.f32.mrf.mxu1 }
 0x2cd   :  { %v1003_v18 = vadd.f32 %v998_v16, %v897_v7 }
 0x2ce   :  { %v1000_v19 = vpop.f32.mrf.mxu1 }
 0x2cf   :  { %v1009_v20 = vadd.f32 %v1187_v17, %v1003_v18 }
 0x2d0   :  { %v1001_v21 = vpop.f32.mrf.mxu1 }
 0x2d1   :  { %v1010_v22 = vmax.f32 %v1009_v20, 0.0 }
 0x2d3   :  { %v1011_v23 = vpack.c.bf16 %v1010_v22, %v1010_v22 }
 0x2d5   :  { %1288 = vmatmul.mubr.msk.bf16.vlgmr.msra.gmra.mxu1 %vm1028_vm2, %v1011_v23 }
 0x395   :  { %v1066_v24 = vpop.f32.mrf.mxu1 }
 0x396   :  { %v1067_v26 = vadd.f32 %v1066_v24, %v996_v15 }
 0x397   :  { %v1289_v27 = vpop.f32.mrf.mxu1 }
 0x398   :  { %v1077_v28 = vadd.f32 %v1191_v25, %v1067_v26 }
 0x399   :  { %v1069_v29 = vpop.f32.mrf.mxu1 }
 0x39a   :  { %1078 = vst [vmem:[#allocation10] sm:$0xff] %v1077_v28 }
 0x39b   :  { %v1290_v30 = vpop.f32.mrf.mxu1 }
 0x39c   :  { %1496 = shalt.err (!%p1493_p10)
}
 0x39d   :  { %1088 = dma.vmem_to_hbm [thread:$0]  %s1086_s3, 128, %s1569_s4, [#allocation4]  }
 0x39e   :  { %1511 = dma.done.wait [#allocation4], 128  }
 0x39f   :  { %1512 = vsyncadd [#allocation4], 4294967168 }
 0x3a0   :  { %1092 = vsyncpa [#allocation3], 1 }
 0x3a1   :  { %1093 = vsyncpa [#allocation6], 1 }
 0x3a2   :  { %1094 = vsyncpa [#allocation9], 1 }
 0x3a3   :  { %1095 = vsyncpa [#allocation4], 1 }

</bundles_post_ra>
